<compile_context>
chip_gen: v7x
topology: tpu7x:2x2x1
jax: 0.10.0
libtpu: 0.0.40
codegen_flags: <defaults>
</compile_context>

<pallas_src>
import jax
import jax.numpy as jnp
from jax.experimental import pallas as pl
from jax.experimental.pallas import tpu as pltpu


def _vae_kernel(x_ref, eps_ref,
                w1_ref, b1_ref, w2_ref, b2_ref,
                w3_ref, b3_ref, w4_ref, b4_ref,
                xrec_ref, mulv_ref):
    latent_dim = eps_ref.shape[-1]

    x = x_ref[...]          # (bm, input_dim)  bf16
    eps = eps_ref[...]      # (bm, latent_dim) f32

    # Hoist bias reads once per grid step (broadcast once, f32).
    b1 = b1_ref[...]
    b2 = b2_ref[...]
    b3 = b3_ref[...]
    b4 = b4_ref[...]

    # ---- encoder: Linear -> ReLU -> Linear (bf16 MXU operands, f32 acc) ----
    h1 = jnp.dot(x, w1_ref[...], preferred_element_type=jnp.float32) + b1
    h1 = jnp.maximum(h1, 0.0)
    h2 = jnp.dot(h1.astype(jnp.bfloat16), w2_ref[...],
                 preferred_element_type=jnp.float32) + b2     # (bm, 2*latent)

    # Store mu|log_var as one combined lane-dense block; split in the wrapper.
    mulv_ref[...] = h2

    # ---- reparameterize: z = mu + eps * exp(0.5 * log_var) (f32) ----
    mu = h2[:, :latent_dim]
    log_var = h2[:, latent_dim:]
    z = mu + eps * jnp.exp(0.5 * log_var)

    # ---- decoder: Linear -> ReLU -> Linear -> Sigmoid ----
    h3 = jnp.dot(z.astype(jnp.bfloat16), w3_ref[...],
                 preferred_element_type=jnp.float32) + b3
    h3 = jnp.maximum(h3, 0.0)
    logits = jnp.dot(h3.astype(jnp.bfloat16), w4_ref[...],
                     preferred_element_type=jnp.float32) + b4
    # sigmoid(x) = 1 / (1 + exp(-x)); exp + approx reciprocal stay on the EUP.
    xrec_ref[...] = pl.reciprocal(1.0 + jnp.exp(-logits), approx=True)


def vae_forward(x, eps, params, *, bm=None):
    """Fused VAE forward pass.

    x:   (B, input_dim) float32
    eps: (B, latent_dim) float32 (the torch.randn_like noise, supplied explicitly)
    params: dict with w1,b1,w2,b2,w3,b3,w4,b4 (weights (in,out), biases (1,out))
    returns (x_recon, mu, log_var), all float32.
    """
    B, input_dim = x.shape
    latent_dim = eps.shape[1]

    if bm is None:
        # Aim for a sizeable tile but keep >=2 grid steps so the pipeline
        # (and megacore sharding on v7x) actually has iterations.
        bm = B
        for cand in (512, 256, 128, 64, 32, 16):
            if B % cand == 0 and B // cand >= 2:
                bm = cand
                break
    assert B % bm == 0, "batch must be divisible by the batch tile"
    assert bm == B or bm % 8 == 0, "bm must be a multiple of 8 (f32 tiling)"

    bf16 = jnp.bfloat16
    x_bf = x.astype(bf16)                       # halves the dominant HBM read
    w1 = params["w1"].astype(bf16)
    w2 = params["w2"].astype(bf16)
    w3 = params["w3"].astype(bf16)
    w4 = params["w4"].astype(bf16)
    b1 = params["b1"].astype(jnp.float32)
    b2 = params["b2"].astype(jnp.float32)
    b3 = params["b3"].astype(jnp.float32)
    b4 = params["b4"].astype(jnp.float32)

    def full(arr):
        # Weight / bias blocks: whole array, same block for every grid step.
        return pl.BlockSpec(arr.shape, lambda i: (0, 0))

    grid = (B // bm,)
    out_shape = (
        jax.ShapeDtypeStruct((B, input_dim), jnp.float32),       # x_recon
        jax.ShapeDtypeStruct((B, 2 * latent_dim), jnp.float32),  # mu | log_var
    )

    x_recon, mulv = pl.pallas_call(
        _vae_kernel,
        out_shape=out_shape,
        grid_spec=pltpu.PrefetchScalarGridSpec(
            num_scalar_prefetch=0,
            grid=grid,
            in_specs=[
                pl.BlockSpec((bm, input_dim), lambda i: (i, 0)),    # x (bf16)
                pl.BlockSpec((bm, latent_dim), lambda i: (i, 0)),   # eps (f32)
                full(w1), full(b1),
                full(w2), full(b2),
                full(w3), full(b3),
                full(w4), full(b4),
            ],
            out_specs=[
                pl.BlockSpec((bm, input_dim), lambda i: (i, 0)),       # x_recon
                pl.BlockSpec((bm, 2 * latent_dim), lambda i: (i, 0)),  # mu|log_var
            ],
        ),
        compiler_params=pltpu.CompilerParams(
            dimension_semantics=("parallel",),
            vmem_limit_bytes=32 * 1024 * 1024,
        ),
    )(x_bf, eps, w1, b1, w2, b2, w3, b3, w4, b4)

    mu = mulv[:, :latent_dim]
    log_var = mulv[:, latent_dim:]
    return x_recon, mu, log_var


def init_params(key, input_dim, hidden_dim, latent_dim):
    """PyTorch-style uniform(-1/sqrt(fan_in)) init; weights stored (in, out)."""
    ks = jax.random.split(key, 8)

    def linear(kw, kb, fan_in, fan_out):
        bound = 1.0 / jnp.sqrt(fan_in)
        w = jax.random.uniform(kw, (fan_in, fan_out), jnp.float32, -bound, bound)
        b = jax.random.uniform(kb, (1, fan_out), jnp.float32, -bound, bound)
        return w, b

    w1, b1 = linear(ks[0], ks[1], input_dim, hidden_dim)
    w2, b2 = linear(ks[2], ks[3], hidden_dim, latent_dim * 2)
    w3, b3 = linear(ks[4], ks[5], latent_dim, hidden_dim)
    w4, b4 = linear(ks[6], ks[7], hidden_dim, input_dim)
    return dict(w1=w1, b1=b1, w2=w2, b2=b2, w3=w3, b3=b3, w4=w4, b4=b4)


def vae_forward_ref_f32(x, eps, p):
    """Pure-JAX f32 reference mirroring the PyTorch forward."""
    h1 = jnp.maximum(x @ p["w1"] + p["b1"], 0.0)
    h = h1 @ p["w2"] + p["b2"]
    latent = eps.shape[1]
    mu, log_var = h[:, :latent], h[:, latent:]
    z = mu + eps * jnp.exp(0.5 * log_var)
    h3 = jnp.maximum(z @ p["w3"] + p["b3"], 0.0)
    x_recon = jax.nn.sigmoid(h3 @ p["w4"] + p["b4"])
    return x_recon, mu, log_var


def vae_forward_ref_bf16(x, eps, p):
    """Reference that mirrors the kernel's bf16-MXU / f32-elementwise recipe."""
    bf16 = jnp.bfloat16
    w1, w2, w3, w4 = (p[k].astype(bf16) for k in ("w1", "w2", "w3", "w4"))
    h1 = jnp.maximum(
        jnp.dot(x.astype(bf16), w1, preferred_element_type=jnp.float32) + p["b1"], 0.0)
    h = jnp.dot(h1.astype(bf16), w2, preferred_element_type=jnp.float32) + p["b2"]
    latent = eps.shape[1]
    mu, log_var = h[:, :latent], h[:, latent:]
    z = mu + eps * jnp.exp(0.5 * log_var)
    h3 = jnp.maximum(
        jnp.dot(z.astype(bf16), w3, preferred_element_type=jnp.float32) + p["b3"], 0.0)
    x_recon = jax.nn.sigmoid(
        jnp.dot(h3.astype(bf16), w4, preferred_element_type=jnp.float32) + p["b4"])
    return x_recon, mu, log_var


if __name__ == "__main__":
    # Lane-friendly small demo dims (multiples of 128 where it matters).
    input_dim, hidden_dim, latent_dim = 128, 128, 64
    batch = 256
    bm = 64                       # grid = (4,) -> pipelined, megacore-splittable

    key = jax.random.PRNGKey(0)
    k_x, k_eps, k_param = jax.random.split(key, 3)

    x = jax.random.uniform(k_x, (batch, input_dim), jnp.float32)       # image-like in [0,1)
    eps = jax.random.normal(k_eps, (batch, latent_dim), jnp.float32)   # torch.randn_like(std)
    params = init_params(k_param, input_dim, hidden_dim, latent_dim)

    x_recon, mu, log_var = vae_forward(x, eps, params, bm=bm)
    jax.block_until_ready((x_recon, mu, log_var))

    # Tight check vs a reference using the same bf16-MXU recipe.
    xr_b, mu_b, lv_b = vae_forward_ref_bf16(x, eps, params)
    assert jnp.allclose(x_recon, xr_b, atol=5e-3, rtol=5e-3), "x_recon mismatch (bf16 ref)"
    assert jnp.allclose(mu, mu_b, atol=5e-3, rtol=5e-3), "mu mismatch (bf16 ref)"
    assert jnp.allclose(log_var, lv_b, atol=5e-3, rtol=5e-3), "log_var mismatch (bf16 ref)"

    # Loose sanity check vs the full-f32 PyTorch-equivalent reference.
    xr_f, mu_f, lv_f = vae_forward_ref_f32(x, eps, params)
    assert jnp.allclose(x_recon, xr_f, atol=5e-2, rtol=5e-2), "x_recon mismatch (f32 ref)"
    assert jnp.allclose(mu, mu_f, atol=5e-2, rtol=5e-2), "mu mismatch (f32 ref)"
    assert jnp.allclose(log_var, lv_f, atol=5e-2, rtol=5e-2), "log_var mismatch (f32 ref)"

    print("KERNEL_OK")
</pallas_src>

<mosaic_0001>
module attributes {stable_mosaic.version = 11 : i64} {
  func.func @_vae_kernel(%arg0: i32, %arg1: memref<64x128xbf16, #tpu.memory_space<vmem>>, %arg2: memref<64x64xf32, #tpu.memory_space<vmem>>, %arg3: memref<128x128xbf16, #tpu.memory_space<vmem>>, %arg4: memref<1x128xf32, #tpu.memory_space<vmem>>, %arg5: memref<128x128xbf16, #tpu.memory_space<vmem>>, %arg6: memref<1x128xf32, #tpu.memory_space<vmem>>, %arg7: memref<64x128xbf16, #tpu.memory_space<vmem>>, %arg8: memref<1x128xf32, #tpu.memory_space<vmem>>, %arg9: memref<128x128xbf16, #tpu.memory_space<vmem>>, %arg10: memref<1x128xf32, #tpu.memory_space<vmem>>, %arg11: memref<64x128xf32, #tpu.memory_space<vmem>>, %arg12: memref<64x128xf32, #tpu.memory_space<vmem>>) attributes {dimension_semantics = [#tpu.dimension_semantics<parallel>], iteration_bounds = array<i64: 4>, scalar_prefetch = 0 : i64, scratch_operands = 0 : i64, tpu.core_type = #tpu.core_type<tc>, window_params = [{transform_indices = @transform_0, window_bounds = array<i64: 64, 128>}, {transform_indices = @transform_1, window_bounds = array<i64: 64, 64>}, {pipeline_mode = #tpu.pipeline_mode<synchronous>, transform_indices = @transform_2, window_bounds = array<i64: 128, 128>}, {pipeline_mode = #tpu.pipeline_mode<synchronous>, transform_indices = @transform_3, window_bounds = array<i64: 1, 128>}, {pipeline_mode = #tpu.pipeline_mode<synchronous>, transform_indices = @transform_4, window_bounds = array<i64: 128, 128>}, {pipeline_mode = #tpu.pipeline_mode<synchronous>, transform_indices = @transform_5, window_bounds = array<i64: 1, 128>}, {pipeline_mode = #tpu.pipeline_mode<synchronous>, transform_indices = @transform_6, window_bounds = array<i64: 64, 128>}, {pipeline_mode = #tpu.pipeline_mode<synchronous>, transform_indices = @transform_7, window_bounds = array<i64: 1, 128>}, {pipeline_mode = #tpu.pipeline_mode<synchronous>, transform_indices = @transform_8, window_bounds = array<i64: 128, 128>}, {pipeline_mode = #tpu.pipeline_mode<synchronous>, transform_indices = @transform_9, window_bounds = array<i64: 1, 128>}, {transform_indices = @transform_10, window_bounds = array<i64: 64, 128>}, {transform_indices = @transform_11, window_bounds = array<i64: 64, 128>}]} {
    %c0 = arith.constant 0 : index
    %c0_0 = arith.constant 0 : index
    %0 = vector.load %arg1[%c0, %c0_0] : memref<64x128xbf16, #tpu.memory_space<vmem>>, vector<64x128xbf16>
    %c0_1 = arith.constant 0 : index
    %c0_2 = arith.constant 0 : index
    %1 = vector.load %arg2[%c0_1, %c0_2] : memref<64x64xf32, #tpu.memory_space<vmem>>, vector<64x64xf32>
    %c0_3 = arith.constant 0 : index
    %c0_4 = arith.constant 0 : index
    %2 = vector.load %arg4[%c0_3, %c0_4] : memref<1x128xf32, #tpu.memory_space<vmem>>, vector<1x128xf32>
    %c0_5 = arith.constant 0 : index
    %c0_6 = arith.constant 0 : index
    %3 = vector.load %arg6[%c0_5, %c0_6] : memref<1x128xf32, #tpu.memory_space<vmem>>, vector<1x128xf32>
    %c0_7 = arith.constant 0 : index
    %c0_8 = arith.constant 0 : index
    %4 = vector.load %arg8[%c0_7, %c0_8] : memref<1x128xf32, #tpu.memory_space<vmem>>, vector<1x128xf32>
    %c0_9 = arith.constant 0 : index
    %c0_10 = arith.constant 0 : index
    %5 = vector.load %arg10[%c0_9, %c0_10] : memref<1x128xf32, #tpu.memory_space<vmem>>, vector<1x128xf32>
    %c0_11 = arith.constant 0 : index
    %c0_12 = arith.constant 0 : index
    %6 = vector.load %arg3[%c0_11, %c0_12] : memref<128x128xbf16, #tpu.memory_space<vmem>>, vector<128x128xbf16>
    %cst = arith.constant dense<0.000000e+00> : vector<64x128xf32>
    %7 = tpu.matmul %0, %6, %cst {dimension_numbers = #tpu.dot_dimension_numbers<[1], [0], [0], [1], [0, 0, 1, 1], [], []>} : vector<64x128xbf16>, vector<128x128xbf16>, vector<64x128xf32> -> vector<64x128xf32>
    %8 = vector.broadcast %2 : vector<1x128xf32> to vector<64x128xf32>
    %9 = arith.addf %7, %8 : vector<64x128xf32>
    %cst_13 = arith.constant 0.000000e+00 : f32
    %10 = vector.broadcast %cst_13 : f32 to vector<64x128xf32>
    %11 = arith.maximumf %9, %10 : vector<64x128xf32>
    %12 = arith.truncf %11 : vector<64x128xf32> to vector<64x128xbf16>
    %c0_14 = arith.constant 0 : index
    %c0_15 = arith.constant 0 : index
    %13 = vector.load %arg5[%c0_14, %c0_15] : memref<128x128xbf16, #tpu.memory_space<vmem>>, vector<128x128xbf16>
    %cst_16 = arith.constant dense<0.000000e+00> : vector<64x128xf32>
    %14 = tpu.matmul %12, %13, %cst_16 {dimension_numbers = #tpu.dot_dimension_numbers<[1], [0], [0], [1], [0, 0, 1, 1], [], []>} : vector<64x128xbf16>, vector<128x128xbf16>, vector<64x128xf32> -> vector<64x128xf32>
    %15 = vector.broadcast %3 : vector<1x128xf32> to vector<64x128xf32>
    %16 = arith.addf %14, %15 : vector<64x128xf32>
    %c0_17 = arith.constant 0 : index
    %c0_18 = arith.constant 0 : index
    %17 = vector.load %arg12[%c0_17, %c0_18] : memref<64x128xf32, #tpu.memory_space<vmem>>, vector<64x128xf32>
    tpu.vector_store %arg12[%c0_17, %c0_18], %16 {strides = array<i32>} : memref<64x128xf32, #tpu.memory_space<vmem>>, vector<64x128xf32>,
    %18 = vector.extract_strided_slice %16 {offsets = [0, 0], sizes = [64, 64], strides = [1, 1]} : vector<64x128xf32> to vector<64x64xf32>
    %19 = vector.extract_strided_slice %16 {offsets = [0, 64], sizes = [64, 64], strides = [1, 1]} : vector<64x128xf32> to vector<64x64xf32>
    %cst_19 = arith.constant 5.000000e-01 : f32
    %20 = vector.broadcast %cst_19 : f32 to vector<64x64xf32>
    %21 = arith.mulf %20, %19 : vector<64x64xf32>
    %22 = math.exp %21 : vector<64x64xf32>
    %23 = arith.mulf %1, %22 : vector<64x64xf32>
    %24 = arith.addf %18, %23 : vector<64x64xf32>
    %25 = arith.truncf %24 : vector<64x64xf32> to vector<64x64xbf16>
    %c0_20 = arith.constant 0 : index
    %c0_21 = arith.constant 0 : index
    %26 = vector.load %arg7[%c0_20, %c0_21] : memref<64x128xbf16, #tpu.memory_space<vmem>>, vector<64x128xbf16>
    %cst_22 = arith.constant dense<0.000000e+00> : vector<64x128xf32>
    %27 = tpu.matmul %25, %26, %cst_22 {dimension_numbers = #tpu.dot_dimension_numbers<[1], [0], [0], [1], [0, 0, 1, 1], [], []>} : vector<64x64xbf16>, vector<64x128xbf16>, vector<64x128xf32> -> vector<64x128xf32>
    %28 = vector.broadcast %4 : vector<1x128xf32> to vector<64x128xf32>
    %29 = arith.addf %27, %28 : vector<64x128xf32>
    %cst_23 = arith.constant 0.000000e+00 : f32
    %30 = vector.broadcast %cst_23 : f32 to vector<64x128xf32>
    %31 = arith.maximumf %29, %30 : vector<64x128xf32>
    %32 = arith.truncf %31 : vector<64x128xf32> to vector<64x128xbf16>
    %c0_24 = arith.constant 0 : index
    %c0_25 = arith.constant 0 : index
    %33 = vector.load %arg9[%c0_24, %c0_25] : memref<128x128xbf16, #tpu.memory_space<vmem>>, vector<128x128xbf16>
    %cst_26 = arith.constant dense<0.000000e+00> : vector<64x128xf32>
    %34 = tpu.matmul %32, %33, %cst_26 {dimension_numbers = #tpu.dot_dimension_numbers<[1], [0], [0], [1], [0, 0, 1, 1], [], []>} : vector<64x128xbf16>, vector<128x128xbf16>, vector<64x128xf32> -> vector<64x128xf32>
    %35 = vector.broadcast %5 : vector<1x128xf32> to vector<64x128xf32>
    %36 = arith.addf %34, %35 : vector<64x128xf32>
    %cst_27 = arith.constant 0.000000e+00 : f32
    %37 = vector.broadcast %cst_27 : f32 to vector<64x128xf32>
    %38 = arith.subf %37, %36 : vector<64x128xf32>
    %39 = math.exp %38 : vector<64x128xf32>
    %cst_28 = arith.constant 1.000000e+00 : f32
    %40 = vector.broadcast %cst_28 : f32 to vector<64x128xf32>
    %41 = arith.addf %40, %39 : vector<64x128xf32>
    %42 = tpu.reciprocal %41 {approx = true} : vector<64x128xf32> -> vector<64x128xf32>
    %c0_29 = arith.constant 0 : index
    %c0_30 = arith.constant 0 : index
    %43 = vector.load %arg11[%c0_29, %c0_30] : memref<64x128xf32, #tpu.memory_space<vmem>>, vector<64x128xf32>
    tpu.vector_store %arg11[%c0_29, %c0_30], %42 {strides = array<i32>} : memref<64x128xf32, #tpu.memory_space<vmem>>, vector<64x128xf32>,
    return
  }
  func.func @transform_0(%arg0: i32) -> (i32, i32) {
    %c0_i32 = arith.constant 0 : i32
    %c0_i32_0 = arith.constant 0 : i32
    return %arg0, %c0_i32 : i32, i32
  }
  func.func @transform_1(%arg0: i32) -> (i32, i32) {
    %c0_i32 = arith.constant 0 : i32
    %c0_i32_0 = arith.constant 0 : i32
    return %arg0, %c0_i32 : i32, i32
  }
  func.func @transform_2(%arg0: i32) -> (i32, i32) {
    %c0_i32 = arith.constant 0 : i32
    %c0_i32_0 = arith.constant 0 : i32
    %c0_i32_1 = arith.constant 0 : i32
    return %c0_i32, %c0_i32_0 : i32, i32
  }
  func.func @transform_3(%arg0: i32) -> (i32, i32) {
    %c0_i32 = arith.constant 0 : i32
    %c0_i32_0 = arith.constant 0 : i32
    %c0_i32_1 = arith.constant 0 : i32
    return %c0_i32, %c0_i32_0 : i32, i32
  }
  func.func @transform_4(%arg0: i32) -> (i32, i32) {
    %c0_i32 = arith.constant 0 : i32
    %c0_i32_0 = arith.constant 0 : i32
    %c0_i32_1 = arith.constant 0 : i32
    return %c0_i32, %c0_i32_0 : i32, i32
  }
  func.func @transform_5(%arg0: i32) -> (i32, i32) {
    %c0_i32 = arith.constant 0 : i32
    %c0_i32_0 = arith.constant 0 : i32
    %c0_i32_1 = arith.constant 0 : i32
    return %c0_i32, %c0_i32_0 : i32, i32
  }
  func.func @transform_6(%arg0: i32) -> (i32, i32) {
    %c0_i32 = arith.constant 0 : i32
    %c0_i32_0 = arith.constant 0 : i32
    %c0_i32_1 = arith.constant 0 : i32
    return %c0_i32, %c0_i32_0 : i32, i32
  }
  func.func @transform_7(%arg0: i32) -> (i32, i32) {
    %c0_i32 = arith.constant 0 : i32
    %c0_i32_0 = arith.constant 0 : i32
    %c0_i32_1 = arith.constant 0 : i32
    return %c0_i32, %c0_i32_0 : i32, i32
  }
  func.func @transform_8(%arg0: i32) -> (i32, i32) {
    %c0_i32 = arith.constant 0 : i32
    %c0_i32_0 = arith.constant 0 : i32
    %c0_i32_1 = arith.constant 0 : i32
    return %c0_i32, %c0_i32_0 : i32, i32
  }
  func.func @transform_9(%arg0: i32) -> (i32, i32) {
    %c0_i32 = arith.constant 0 : i32
    %c0_i32_0 = arith.constant 0 : i32
    %c0_i32_1 = arith.constant 0 : i32
    return %c0_i32, %c0_i32_0 : i32, i32
  }
  func.func @transform_10(%arg0: i32) -> (i32, i32) {
    %c0_i32 = arith.constant 0 : i32
    %c0_i32_0 = arith.constant 0 : i32
    return %arg0, %c0_i32 : i32, i32
  }
  func.func @transform_11(%arg0: i32) -> (i32, i32) {
    %c0_i32 = arith.constant 0 : i32
    %c0_i32_0 = arith.constant 0 : i32
    return %arg0, %c0_i32 : i32, i32
  }
}

</mosaic_0001>

<bundles_post_ra>
// kernel: tpu_custom_call.1
= control target key start
LH: loop header
LB: loop body
LE: loop exit
PB: predicated region body
PF: predicated region fallthrough
CT: control target
= control target key end

     0   :  { %s2079_s0 = inlined_call_operand.vmem [shape: bf16[256,128], index: 0, kind: input, shape index: {}]   ;;  %s2080_s1 = inlined_call_operand.vmem [shape: f32[256,64], index: 1, kind: input, shape index: {}]   ;;  %s2081_s2 = inlined_call_operand.vmem [shape: bf16[128,128], index: 2, kind: input, shape index: {}]   ;;  %s2082_s3 = inlined_call_operand.vmem [shape: f32[1,128], index: 3, kind: input, shape index: {}]   ;;  %s2083_s4 = inlined_call_operand.vmem [shape: bf16[128,128], index: 4, kind: input, shape index: {}]   ;;  %s2084_s5 = inlined_call_operand.vmem [shape: f32[1,128], index: 5, kind: input, shape index: {}]   ;;  %s2085_s6 = inlined_call_operand.vmem [shape: bf16[64,128], index: 6, kind: input, shape index: {}]   ;;  %s2086_s7 = inlined_call_operand.vmem [shape: f32[1,128], index: 7, kind: input, shape index: {}]   ;;  %s2087_s8 = inlined_call_operand.vmem [shape: bf16[128,128], index: 8, kind: input, shape index: {}]   ;;  %s2088_s9 = inlined_call_operand.vmem [shape: f32[1,128], index: 9, kind: input, shape index: {}]   ;;  %s2089_s10 = inlined_call_operand.hbm [shape: f32[256,128], index: 10, kind: output, shape index: {0}]   ;;  %s2090_s11 = inlined_call_operand.hbm [shape: f32[256,128], index: 11, kind: output, shape index: {1}]  }
   0x1   :  { %2093 = sst [smem:[#allocation9_spill]] %s2079_s0 }
   0x2   :  { %17 = vsyncpa [#allocation3], 0 }
   0x3   :  { %19 = vsyncpa [#allocation3 + $0x1], 0 }
   0x4   :  { %20 = vsyncpa [#allocation5], 0 }
   0x5   :  { %22 = vsyncpa [#allocation5 + $0x1], 0  ;;  %s1765_s17 = smov 0   ;;  %s1767_s18 = smov 0  }
   0x6   :  { %s1769_s19 = smov 0   ;;  %s1771_s20 = smov 0  }
   0x7 LB: > { %s1786_s21 = sadd.s32 4294967295, %s1698_s20   ;;  %s1285_s22 = sadd.s32 4294967294, %s1698_s20   ;;  %s1698_s20 = sphi %s1771_s20, %s2105_s20   ;;  %s1694_s19 = sphi %s1769_s19, %s2104_s19   ;;  %s1690_s18 = sphi %s1767_s18, %s2103_s18   ;;  %s1686_s17 = sphi %s1765_s17, %s2102_s17  }
   0x8   : > { %s1790_s23 = sadd.s32 1, %s1698_s20   ;;  %s255_s24 = sadd.s32 1, %s1694_s19 }
   0x9   : > { %s252_s25 = ssub.s32 %s1698_s20, %s1790_s23  ;;  %p265_p0 = scmp.ne.s32.totalorder %s1694_s19, %s1690_s18 }
   0xa   : > { %p253_p1 = scmp.eq.s32.totalorder %s252_s25, 0  ;;  %p266_p2 = scmp.eq.s32.totalorder %s1786_s21, 3 }
   0xb   : > { %p271_p3 = scmp.ne.s32.totalorder %s1690_s18, %s1686_s17  ;;  %p272_p4 = scmp.eq.s32.totalorder %s1285_s22, 3 }
   0xc   : > { %s1801_s26 = scalar_select %p253_p1, %s1694_s19, %s255_s24  }
   0xd   : > { %p1803_p5 = por %p266_p2, %p265_p0  ;;  %p1807_p6 = por %p272_p4, %p271_p3 }
   0xe   : > { %2094 = sst [smem:[#allocation8_spill]] %s1801_s26  ;;  %p1288_p7 = scmp.ge.s32.totalorder %s1698_s20, 1 }
   0xf   : > { %p358_p8 = scmp.lt.s32.totalorder %s1698_s20, 5 }
  0x11   : > { %p359_p9 = pnand %p1288_p7, %p358_p8 }
  0x12   : > { %v1524_v0 = vld [vmem:[%s2081_s2] sm:$0xff] (!%p359_p9)   ;;  %s1291_s12 = sshll.u32 (!%p359_p9), %s1786_s21, 3  ;;  %v1525_v1 = vld [vmem:[%s2081_s2 + $0x8] sm:$0xff] (!%p359_p9)   ;;  %v1526_v2 = vld [vmem:[%s2081_s2 + $0x10] sm:$0xff] (!%p359_p9)   ;;  %s2097_s0 = sld [smem:[#allocation9_spill]] (!%p359_p9)  ;;  %vm871_vm0 = vcmask (!%p359_p9), 523264  }
  0x13   : > { %362 = sbr.rel (%p359_p9) target bundleno = 1120 (0x460), region = 60  ;;  %p409_p10 = scmp.lt.s32.totalorder (!%p359_p9), %s1291_s12, 31  ;;  %1389 = vmatprep.subr.bf16.mxu0 (!%p359_p9), %v1524_v0  ;;  %v1527_v3 = vld [vmem:[%s2081_s2 + $0x18] sm:$0xff] (!%p359_p9)   ;;  %v1528_v5 = vld [vmem:[%s2081_s2 + $0x20] sm:$0xff] (!%p359_p9)   ;;  %v1537_v7 = vld [vmem:[%s2083_s4 + $0x8] sm:$0xff] (!%p359_p9)  }
  0x14   : > { %1390 = vmatpush3.bf16.msra.mxu0 (!%p359_p9), %v1524_v0  ;;  %v1536_v6 = vld [vmem:[%s2083_s4] sm:$0xff] (!%p359_p9)   ;;  %v1529_v8 = vld [vmem:[%s2081_s2 + $0x28] sm:$0xff] (!%p359_p9)   ;;  %v1538_v9 = vld [vmem:[%s2083_s4 + $0x10] sm:$0xff] (!%p359_p9)   ;;  %s1881_s13 = sand.u32 (!%p359_p9), 1, %s1690_s18   ;;  %s1700_s16 = smov (!%p359_p9), 64  }
  0x15   : > { %1391 = vmatprep.subr.bf16.mxu0 (!%p359_p9), %v1525_v1  ;;  %1413 = vmatprep.subr.bf16.mxu1 (!%p359_p9), %v1536_v6  ;;  %v1530_v10 = vld [vmem:[%s2081_s2 + $0x30] sm:$0xff] (!%p359_p9)   ;;  %v1539_v11 = vld [vmem:[%s2083_s4 + $0x18] sm:$0xff] (!%p359_p9)   ;;  %v1540_v13 = vld [vmem:[%s2083_s4 + $0x20] sm:$0xff] (!%p359_p9)   ;;  %s2091_s14 = sshll.u32 (!%p359_p9), %s1881_s13, 6  ;;  %s2092_s26 = sshll.u32 (!%p359_p9), %s1786_s21, 10 }
  0x16   : > { %1414 = vmatpush3.bf16.msra.mxu1 (!%p359_p9), %v1536_v6  ;;  %v1531_v12 = vld [vmem:[%s2081_s2 + $0x38] sm:$0xff] (!%p359_p9)   ;;  %v1541_v14 = vld [vmem:[%s2083_s4 + $0x28] sm:$0xff] (!%p359_p9)   ;;  %v1542_v18 = vld [vmem:[%s2083_s4 + $0x30] sm:$0xff] (!%p359_p9)   ;;  %s1701_s25 = smov (!%p359_p9), [#allocation4]  }
  0x17   : > { %1415 = vmatprep.subr.bf16.mxu1 (!%p359_p9), %v1537_v7  ;;  %v1543_v19 = vld [vmem:[%s2083_s4 + $0x38] sm:$0xff] (!%p359_p9)   ;;  %v1295_v20 = vld [vmem:[%s2082_s3] ss:$0 sm:$0xff] (!%p359_p9)  ;;  %v1545_v59 = vld [vmem:[%s2085_s6 + $0x8] sm:$0xff] (!%p359_p9)   ;;  %s1608_s30 = sshll.u32 (!%p359_p9), %s1701_s25, 4  ;;  %s1609_s30 = int_to_ptr.vmem [resolvable:$false] %s1608_s30 }
  0x18   : > { %1392 = vmatpush3.bf16.msra.mxu0 (!%p359_p9), %v1525_v1  ;;  %v1544_v49 = vld [vmem:[%s2085_s6] sm:$0xff] (!%p359_p9)  }
  0x19   : > { %1393 = vmatprep.subr.bf16.mxu0 (!%p359_p9), %v1526_v2  ;;  %v1308_v50 = vld [vmem:[%s2084_s5] ss:$0 sm:$0xff] (!%p359_p9) }
  0x1a   : > { %s2107_s12 = smov (!%p409_p10, %s1291_s12), 31  ;;  %1416 = vmatpush3.bf16.msra.mxu1 %v1537_v7 }
  0x1b   : > { %s1292_s22 = sshll.u32 %s2107_s12, 2  ;;  %1417 = vmatprep.subr.bf16.mxu1 %v1538_v9 }
  0x1c   : > { %s1829_s29 = scalar_lea.vmem %s2097_s0, %s1292_s22  ;;  %1394 = vmatpush3.bf16.msra.mxu0 %v1526_v2  ;;  %s1893_s22 = scalar_lea.vmem [#allocation4], %s2091_s14 }
  0x1d   : > { %v1532_v4 = vld [vmem:[%s1829_s29] sm:$0xff]   ;;  %1395 = vmatprep.subr.bf16.mxu0 %v1527_v3  ;;  %v1533_v15 = vld [vmem:[%s1829_s29 + $0x8] sm:$0xff]   ;;  %v1534_v16 = vld [vmem:[%s1829_s29 + $0x10] sm:$0xff]   ;;  %s1179_s0 = sshll.u32 %s1893_s22, 4  ;;  %s1992_s0 = int_to_ptr.vmem [resolvable:$true] %s1179_s0 }
  0x1e   : > { %1405 = vmatprep.mubr.bf16.mxu0 %v1532_v4  ;;  %1418 = vmatpush3.bf16.msra.mxu1 %v1538_v9  ;;  %v1535_v17 = vld [vmem:[%s1829_s29 + $0x18] sm:$0xff]   ;;  %s1604_s14 = scalar_lea.vmem %s1992_s0, 1024  ;;  %s1610_s29 = scalar_lea.vmem %s1609_s30, 2048 }
  0x1f   : > { %1419 = vmatprep.subr.bf16.mxu1 %v1539_v11  ;;  %p1605_p11 = scmp.ne.s32.totalorder %s1992_s0, %s1604_s14  ;;  %p1611_p0 = scmp.lt.s32.totalorder %s1992_s0, %s1609_s30 }
  0x20   : > { %1396 = vmatpush3.bf16.msra.mxu0 %v1527_v3  ;;  %v1546_v3 = vld [vmem:[%s2085_s6 + $0x10] sm:$0xff]   ;;  %p1612_p1 = scmp.lt.s32.totalorder %s1610_s29, %s1604_s14 }
  0x21   : > { %1397 = vmatprep.subr.bf16.mxu0 %v1528_v5  ;;  %p1606_p12 = pnand %p1605_p11, %p1803_p5 }
  0x22   : > { %1420 = vmatpush3.bf16.msra.mxu1 %v1539_v11  ;;  %p1613_p2 = por %p1612_p1, %p1611_p0 }
  0x23   : > { %1421 = vmatprep.subr.bf16.mxu1 %v1540_v13  ;;  %p1607_p13 = pneg %p1606_p12 }
  0x24   : > { %1398 = vmatpush3.bf16.msra.mxu0 %v1528_v5 }
  0x25   : > { %1399 = vmatprep.subr.bf16.mxu0 %v1529_v8  ;;  %p1614_p3 = pnand %p1613_p2, %p1607_p13 }
  0x26   : > { %1422 = vmatpush3.bf16.msra.mxu1 %v1540_v13 }
  0x27   : > { %1423 = vmatprep.subr.bf16.mxu1 %v1541_v14 }
  0x28   : > { %1400 = vmatpush3.bf16.msra.mxu0 %v1529_v8 }
  0x29   : > { %1401 = vmatprep.subr.bf16.mxu0 %v1530_v10 }
  0x2a   : > { %1424 = vmatpush3.bf16.msra.mxu1 %v1541_v14 }
  0x2b   : > { %1425 = vmatprep.subr.bf16.mxu1 %v1542_v18 }
  0x2c   : > { %1402 = vmatpush3.bf16.msra.mxu0 %v1530_v10 }
  0x2d   : > { %1403 = vmatprep.subr.bf16.mxu0 %v1531_v12 }
  0x2e   : > { %1426 = vmatpush3.bf16.msra.mxu1 %v1542_v18 }
  0x2f   : > { %1427 = vmatprep.subr.bf16.mxu1 %v1543_v19 }
  0x30   : > { %1404 = vmatpush3.bf16.msra.mxu0 %v1531_v12  ;;  %v1547_v12 = vld [vmem:[%s2085_s6 + $0x18] sm:$0xff]  }
  0x31   : > { %1437 = vmatprep.subr.bf16.mxu0 %v1544_v49 }
  0x32   : > { %1428 = vmatpush3.bf16.msra.mxu1 %v1543_v19 }
  0x33   : > { %1406 = vmatmul.mubr.bf16.vlgmr.msra.gmra.mrb[0].mxu0 %v1533_v15 }
  0x34   : > { %1409 = vmatprep.mubr.bf16.mxu0 %v1534_v16  ;;  %1438 = vmatpush3.bf16.msra.mxu0 %v1544_v49 }
  0x35   : > { %1439 = vmatprep.subr.bf16.mxu0 %v1545_v59 }
  0x38   : > { %1440 = vmatpush3.bf16.msra.mxu0 %v1545_v59 }
  0x39   : > { %1441 = vmatprep.subr.bf16.mxu0 %v1546_v3 }
  0x3b   : > { %1410 = vmatmul.mubr.bf16.gmra.mrb[4].mxu0 %v1535_v17 }
  0x3c   : > { %1442 = vmatpush3.bf16.msra.mxu0 %v1546_v3 }
  0x3d   : > { %1443 = vmatprep.subr.bf16.mxu0 %v1547_v12 }
  0x40   : > { %1444 = vmatpush3.bf16.msra.mxu0 %v1547_v12 }
 0x106   : > { %v1407_v21 = vpop.f32.mrb[0].mxu0 }
 0x107   : > { %v580_v22 = vadd.f32 %v1407_v21, %v1295_v20  ;;  %v571_v23 = vpop.f32.mrb[1].mxu0 }
 0x108   : > { %v572_v24 = vadd.f32 %v1295_v20, %v571_v23  ;;  %v1408_v25 = vpop.f32.mrb[2].mxu0 }
 0x109   : > { %v583_v26 = vadd.f32 %v1408_v25, %v1295_v20  ;;  %v574_v27 = vpop.f32.mrb[3].mxu0  ;;  %v604_v29 = vmax.f32 %v580_v22, 0.0 }
 0x10a   : > { %v575_v28 = vadd.f32 %v1295_v20, %v574_v27  ;;  %v602_v31 = vmax.f32 %v572_v24, 0.0  ;;  %v1548_v27 = vld [vmem:[%s2087_s8] sm:$0xff]  }
 0x10b   : > { %v605_v30 = vmax.f32 %v583_v26, 0.0  ;;  %1453 = vmatprep.subr.bf16.mxu1 %v1548_v27 }
 0x10c   : > { %v603_v32 = vmax.f32 %v575_v28, 0.0  ;;  %v1549_v28 = vld [vmem:[%s2087_s8 + $0x8] sm:$0xff]  }
 0x10d   : > { %v611_v33 = vpack.c.bf16 %v605_v30, %v604_v29 }
 0x10e   : > { %v1411_v34 = vpop.f32.mrb[4].mxu0  ;;  %v610_v35 = vpack.c.bf16 %v603_v32, %v602_v31  ;;  %v1550_v31 = vld [vmem:[%s2087_s8 + $0x10] sm:$0xff]  }
 0x10f   : > { %v596_v36 = vadd.f32 %v1411_v34, %v1295_v20  ;;  %v587_v37 = vpop.f32.mrb[5].mxu0  ;;  %v1552_v34 = vld [vmem:[%s2087_s8 + $0x20] sm:$0xff]  }
 0x110   : > { %v588_v38 = vadd.f32 %v1295_v20, %v587_v37  ;;  %v1412_v39 = vpop.f32.mrb[6].mxu0  ;;  %1429 = vmatprep.mubr.bf16.mxu1 %v610_v35  ;;  %v1553_v35 = vld [vmem:[%s2087_s8 + $0x28] sm:$0xff]  }
 0x111   : > { %v599_v40 = vadd.f32 %v1412_v39, %v1295_v20  ;;  %v590_v41 = vpop.f32.mrb[7].mxu0  ;;  %1430 = vmatmul.mubr.bf16.vlgmr.msra.gmra.mrb[0].mxu1 %v611_v33  ;;  %v608_v43 = vmax.f32 %v596_v36, 0.0  ;;  %v1551_v33 = vld [vmem:[%s2087_s8 + $0x18] sm:$0xff]  }
 0x112   : > { %v591_v42 = vadd.f32 %v1295_v20, %v590_v41  ;;  %v606_v45 = vmax.f32 %v588_v38, 0.0  ;;  %1454 = vmatpush3.bf16.msra.mxu1 %v1548_v27 }
 0x113   : > { %v609_v44 = vmax.f32 %v599_v40, 0.0  ;;  %1455 = vmatprep.subr.bf16.mxu1 %v1549_v28 }
 0x114   : > { %v607_v46 = vmax.f32 %v591_v42, 0.0 }
 0x115   : > { %v613_v47 = vpack.c.bf16 %v609_v44, %v608_v43 }
 0x116   : > { %v612_v48 = vpack.c.bf16 %v607_v46, %v606_v45  ;;  %1456 = vmatpush3.bf16.msra.mxu1 %v1549_v28 }
 0x117   : > { %1457 = vmatprep.subr.bf16.mxu1 %v1550_v31 }
 0x118   : > { %1433 = vmatprep.mubr.bf16.mxu1 %v612_v48 }
 0x119   : > { %1434 = vmatmul.mubr.bf16.gmra.mrb[4].mxu1 %v613_v47 }
 0x11a   : > { %1458 = vmatpush3.bf16.msra.mxu1 %v1550_v31 }
 0x11b   : > { %1459 = vmatprep.subr.bf16.mxu1 %v1551_v33 }
 0x11e   : > { %1460 = vmatpush3.bf16.msra.mxu1 %v1551_v33 }
 0x11f   : > { %1461 = vmatprep.subr.bf16.mxu1 %v1552_v34 }
 0x122   : > { %1462 = vmatpush3.bf16.msra.mxu1 %v1552_v34 }
 0x123   : > { %1463 = vmatprep.subr.bf16.mxu1 %v1553_v35 }
 0x126   : > { %1464 = vmatpush3.bf16.msra.mxu1 %v1553_v35 }
 0x1e4   : > { %v1431_v51 = vpop.f32.mrb[0].mxu1 }
 0x1e5   : > { %v1887_v52 = vadd.f32 %v1431_v51, %v1308_v50  ;;  %v718_v53 = vpop.f32.mrb[1].mxu1 }
 0x1e6   : > { %v1889_v54 = vadd.f32 %v1308_v50, %v718_v53  ;;  %v1432_v55 = vpop.f32.mrb[2].mxu1 }
 0x1e7   : > { %751 = vst [vmem:[%s1893_s22 + $0x10] sm:$0xff] %v1887_v52  ;;  %v759_v56 = vmul.f32 0.5, %v1887_v52  ;;  %v1898_v57 = vadd.f32 %v1432_v55, %v1308_v50  ;;  %v721_v58 = vpop.f32.mrb[3].mxu1 }
 0x1e8   : > { %749 = vst [vmem:[%s1893_s22] sm:$0xff] %v1889_v54  ;;  %v757_v60 = vmul.f32 0.5, %v1889_v54  ;;  %v1906_v61 = vadd.f32 %v1308_v50, %v721_v58 }
 0x1e9   : > { %v769_v62 = vmul.f32 1.442695, %v759_v56  ;;  %752 = vst [vmem:[%s1893_s22 + $0x18] sm:$0xff] %v1898_v57  ;;  %v760_v63 = vmul.f32 0.5, %v1898_v57 }
 0x1ea   : > { %v765_v0 = vmul.f32 1.442695, %v757_v60  ;;  %750 = vst [vmem:[%s1893_s22 + $0x8] sm:$0xff] %v1906_v61  ;;  %v758_v1 = vmul.f32 0.5, %v1906_v61 }
 0x1eb   : > { %1556 = vpow2.f32 %v769_v62  ;;  %v771_v2 = vmul.f32 1.442695, %v760_v63 }
 0x1ec   : > { %1558 = vpow2.f32 %v765_v0  ;;  %v767_v4 = vmul.f32 1.442695, %v758_v1  ;;  %v1435_v5 = vpop.f32.mrb[4].mxu1 }
 0x1ed   : > { %v1917_v6 = vadd.f32 %v1435_v5, %v1308_v50  ;;  %v734_v7 = vpop.f32.mrb[5].mxu1  ;;  %1560 = vpow2.f32 %v771_v2 }
 0x1ee   : > { %v1919_v8 = vadd.f32 %v1308_v50, %v734_v7  ;;  %v1436_v9 = vpop.f32.mrb[6].mxu1  ;;  %1562 = vpow2.f32 %v767_v4 }
 0x1ef   : > { %755 = vst [vmem:[%s1893_s22 + $0x30] sm:$0xff] %v1917_v6  ;;  %v1923_v10 = vadd.f32 %v1436_v9, %v1308_v50  ;;  %v737_v11 = vpop.f32.mrb[7].mxu1  ;;  %v763_v13 = vmul.f32 0.5, %v1917_v6 }
 0x1f0   : > { %753 = vst [vmem:[%s1893_s22 + $0x20] sm:$0xff] %v1919_v8  ;;  %v761_v14 = vmul.f32 0.5, %v1919_v8  ;;  %v1932_v15 = vadd.f32 %v1308_v50, %v737_v11  ;;  %v1554_v11 = vld [vmem:[%s2087_s8 + $0x30] sm:$0xff]  }
 0x1f1   : > { %756 = vst [vmem:[%s1893_s22 + $0x38] sm:$0xff] %v1923_v10  ;;  %v764_v17 = vmul.f32 0.5, %v1923_v10  ;;  %v777_v19 = vmul.f32 1.442695, %v763_v13  ;;  %1465 = vmatprep.subr.bf16.mxu1 %v1554_v11 }
 0x1f2   : > { %v773_v16 = vmul.f32 1.442695, %v761_v14  ;;  %754 = vst [vmem:[%s1893_s22 + $0x28] sm:$0xff] %v1932_v15  ;;  %v762_v18 = vmul.f32 0.5, %v1932_v15  ;;  %1466 = vmatpush3.bf16.msra.mxu1 %v1554_v11 }
 0x1f3   : > { %v779_v23 = vmul.f32 1.442695, %v764_v17 }
 0x1f4   : > { %1564 = vpow2.f32 %v773_v16  ;;  %v775_v20 = vmul.f32 1.442695, %v762_v18 }
 0x1f5   : > { %v1557_v21 = vpop.eup %1556 }
 0x1f6   : > { %v1559_v22 = vpop.eup %1558  ;;  %1566 = vpow2.f32 %v775_v20  ;;  %793 = vrot.lane.b32.xlu1 %v1557_v21, %s1700_s16 }
 0x1f7   : > { %789 = vrot.lane.b32.xlu0 %v1559_v22, %s1700_s16  ;;  %1568 = vpow2.f32 %v777_v19  ;;  %v1561_v24 = vpop.eup %1560 }
 0x1f8   : > { %v1563_v25 = vpop.eup %1562  ;;  %1570 = vpow2.f32 %v779_v23 }
 0x1fa   : > { %795 = vrot.lane.b32.xlu1 %v1561_v24, %s1700_s16 }
 0x1fb   : > { %791 = vrot.lane.b32.xlu0 %v1563_v25, %s1700_s16 }
 0x1fe   : > { %v1565_v26 = vpop.eup %1564 }
 0x1ff   : > { %797 = vrot.lane.b32.xlu0 %v1565_v26, %s1700_s16 }
 0x200   : > { %v1567_v29 = vpop.eup %1566 }
 0x201   : > { %799 = vrot.lane.b32.xlu1 %v1567_v29, %s1700_s16  ;;  %v1569_v30 = vpop.eup %1568 }
 0x202   : > { %v1571_v32 = vpop.eup %1570 }
 0x203   : > { %801 = vrot.lane.b32.xlu0 %v1569_v30, %s1700_s16 }
 0x205   : > { %803 = vrot.lane.b32.xlu1 %v1571_v32, %s1700_s16  ;;  %s1294_s16 = sshll.u32 %s2107_s12, 3  ;;  %s1150_s12 = scalar_lea.sflag [#allocation5], %s1881_s13 }
 0x206   : > { %s418_s24 = scalar_lea.vmem %s2080_s1, %s1294_s16 }
 0x207   : > { %v431_v37 = vld [vmem:[%s418_s24] sm:$0xff]  ;;  %v433_v39 = vld [vmem:[%s418_s24 + $0x10] sm:$0xff]  ;;  %v434_v40 = vld [vmem:[%s418_s24 + $0x18] sm:$0xff] }
 0x208   : > { %v432_v41 = vld [vmem:[%s418_s24 + $0x8] sm:$0xff]  ;;  %v435_v49 = vld [vmem:[%s418_s24 + $0x20] sm:$0xff]  ;;  %v437_v63 = vld [vmem:[%s418_s24 + $0x30] sm:$0xff] }
 0x209   : > { %v436_v56 = vld [vmem:[%s418_s24 + $0x28] sm:$0xff]  ;;  %v438_v1 = vld [vmem:[%s418_s24 + $0x38] sm:$0xff]  ;;  %s1989_s24 = scalar_lea.hbm %s2090_s11, %s2092_s26 }
 0x268   : > { %v794_v36 = vpop.permute.xlu1 %793 }
 0x269   : > { %v790_v38 = vpop.permute.xlu0 %789  ;;  %v815_v44 = vmul.f32 %v794_v36, %v433_v39 }
 0x26a   : > { %v813_v42 = vmul.f32 %v790_v38, %v431_v37 }
 0x26b   : > { %v823_v53 = vadd.f32 %v815_v44, %v1887_v52 }
 0x26c   : > { %v796_v43 = vpop.permute.xlu1 %795  ;;  %v821_v50 = vadd.f32 %v813_v42, %v1889_v54 }
 0x26d   : > { %v816_v45 = vmul.f32 %v796_v43, %v434_v40  ;;  %v792_v46 = vpop.permute.xlu0 %791 }
 0x26e   : > { %v814_v47 = vmul.f32 %v792_v46, %v432_v41 }
 0x26f   : > { %v824_v48 = vadd.f32 %v816_v45, %v1898_v57 }
 0x270   : > { %v822_v51 = vadd.f32 %v814_v47, %v1906_v61 }
 0x271   : > { %v798_v55 = vpop.permute.xlu0 %797  ;;  %v830_v60 = vpack.c.bf16 %v824_v48, %v823_v53 }
 0x272   : > { %v829_v58 = vpack.c.bf16 %v822_v51, %v821_v50  ;;  %v817_v59 = vmul.f32 %v798_v55, %v435_v49 }
 0x273   : > { %v800_v62 = vpop.permute.xlu1 %799 }
 0x274   : > { %v818_v0 = vmul.f32 %v800_v62, %v436_v56  ;;  %1445 = vmatprep.mubr.msk.bf16.mxu0 %vm871_vm0, %v829_v58  ;;  %v825_v54 = vadd.f32 %v817_v59, %v1919_v8  ;;  %v1555_v8 = vld [vmem:[%s2087_s8 + $0x38] sm:$0xff]  }
 0x275   : > { %1446 = vmatmul.mubr.msk.bf16.vlgmr.msra.gmra.mrb[8].mxu0 %vm871_vm0, %v830_v60  ;;  %v802_v57 = vpop.permute.xlu0 %801  ;;  %1467 = vmatprep.subr.bf16.mxu1 %v1555_v8 }
 0x276   : > { %v826_v61 = vadd.f32 %v818_v0, %v1932_v15  ;;  %v819_v52 = vmul.f32 %v802_v57, %v437_v63  ;;  %1468 = vmatpush3.bf16.msra.mxu1 %v1555_v8 }
 0x277   : > { %v804_v2 = vpop.permute.xlu1 %803 }
 0x278   : > { %v831_v3 = vpack.c.bf16 %v826_v61, %v825_v54  ;;  %v820_v4 = vmul.f32 %v804_v2, %v438_v1  ;;  %v827_v5 = vadd.f32 %v819_v52, %v1917_v6  ;;  %v1317_v6 = vld [vmem:[%s2086_s7] ss:$0 sm:$0xff] }
 0x27a   : > { %v828_v7 = vadd.f32 %v820_v4, %v1923_v10  ;;  %1449 = vmatprep.mubr.msk.bf16.mxu0 %vm871_vm0, %v831_v3 }
 0x27c   : > { %v832_v9 = vpack.c.bf16 %v828_v7, %v827_v5 }
 0x27e   : > { %1450 = vmatmul.mubr.msk.bf16.gmra.mrb[12].mxu0 %vm871_vm0, %v832_v9 }
 0x348   : > { %v1447_v10 = vpop.f32.mrb[8].mxu0 }
 0x349   : > { %v927_v12 = vadd.f32 %v1447_v10, %v1317_v6  ;;  %v918_v13 = vpop.f32.mrb[9].mxu0 }
 0x34a   : > { %v919_v14 = vadd.f32 %v1317_v6, %v918_v13  ;;  %v1448_v15 = vpop.f32.mrb[10].mxu0 }
 0x34b   : > { %v930_v16 = vadd.f32 %v1448_v15, %v1317_v6  ;;  %v921_v17 = vpop.f32.mrb[11].mxu0  ;;  %v951_v19 = vmax.f32 %v927_v12, 0.0 }
 0x34c   : > { %v922_v18 = vadd.f32 %v1317_v6, %v921_v17  ;;  %v949_v21 = vmax.f32 %v919_v14, 0.0 }
 0x34d   : > { %v952_v20 = vmax.f32 %v930_v16, 0.0 }
 0x34e   : > { %v950_v22 = vmax.f32 %v922_v18, 0.0 }
 0x34f   : > { %v958_v23 = vpack.c.bf16 %v952_v20, %v951_v19 }
 0x350   : > { %v957_v24 = vpack.c.bf16 %v950_v22, %v949_v21 }
 0x351   : > { %v1451_v25 = vpop.f32.mrb[12].mxu0 }
 0x352   : > { %v943_v26 = vadd.f32 %v1451_v25, %v1317_v6  ;;  %v934_v27 = vpop.f32.mrb[13].mxu0  ;;  %1469 = vmatprep.mubr.bf16.mxu1 %v957_v24 }
 0x353   : > { %v935_v28 = vadd.f32 %v1317_v6, %v934_v27  ;;  %v1452_v29 = vpop.f32.mrb[14].mxu0  ;;  %1470 = vmatmul.mubr.bf16.vlgmr.msra.gmra.mrb[8].mxu1 %v958_v23 }
 0x354   : > { %v946_v30 = vadd.f32 %v1452_v29, %v1317_v6  ;;  %v937_v31 = vpop.f32.mrb[15].mxu0  ;;  %v955_v33 = vmax.f32 %v943_v26, 0.0 }
 0x355   : > { %v938_v32 = vadd.f32 %v1317_v6, %v937_v31  ;;  %v953_v35 = vmax.f32 %v935_v28, 0.0 }
 0x356   : > { %v956_v34 = vmax.f32 %v946_v30, 0.0 }
 0x357   : > { %v954_v36 = vmax.f32 %v938_v32, 0.0 }
 0x358   : > { %v960_v37 = vpack.c.bf16 %v956_v34, %v955_v33 }
 0x359   : > { %v959_v38 = vpack.c.bf16 %v954_v36, %v953_v35 }
 0x35b   : > { %1473 = vmatprep.mubr.bf16.mxu1 %v959_v38 }
 0x35c   : > { %1474 = vmatmul.mubr.bf16.gmra.mrb[12].mxu1 %v960_v37 }
 0x35d   : > { %1617 = shalt.err (!%p1614_p3)
}
 0x35e   : > { %s1618_s22 = scalar_lea.hbm %s1989_s24, 1024  ;;  %s1622_s25 = scalar_lea.hbm %s2090_s11, 4096 }
 0x35f   : > { %p1619_p4 = scmp.ne.s32.totalorder %s1989_s24, %s1618_s22  ;;  %p1623_p9 = scmp.lt.u32.totalorder %s1989_s24, %s2090_s11 }
 0x360   : > { %p1624_p10 = scmp.lt.u32.totalorder %s1622_s25, %s1618_s22  ;;  %p1626_p12 = scmp.lt.u32.totalorder %s1618_s22, %s1989_s24 }
 0x361   : > { %p1620_p7 = pnand %p1619_p4, %p1803_p5 }
 0x362   : > { %p1625_p11 = por %p1624_p10, %p1623_p9 }
 0x363   : > { %p1621_p8 = pneg %p1620_p7 }
 0x364   : > { %p1627_p13 = por %p1626_p12, %p1625_p11 }
 0x366   : > { %p1628_p0 = pnand %p1627_p13, %p1621_p8 }
 0x368   : > { %1631 = shalt.err (!%p1628_p0)
}
 0x369   : > { %s1702_s14 = smov 128   ;;  %s1703_s29 = smov 8   ;;  %v1326_v39 = vld [vmem:[%s2088_s9] ss:$0 sm:$0xff] }
 0x36a   : > { %1478 = dma.vmem_to_hbm [thread:$0]  (%p1803_p5), %s1992_s0, 1024, %s1989_s24, %s1150_s12, %s1702_s14, %s1702_s14, %s1703_s29  }
 0x36b   : > { %s2098_s24 = sshll.u32 %s1881_s13, 6  ;;  %s2099_s22 = sshll.u32 %s1786_s21, 10 }
 0x36c   : > { %s400_s0 = scalar_lea.vmem [#allocation2], %s2098_s24  ;;  %s2031_s30 = scalar_lea.hbm %s2089_s10, %s2099_s22 }
 0x36d   : > { %s1163_s12 = sshll.u32 %s400_s0, 4  ;;  %s1704_s21 = smov [#allocation2]   ;;  %s2033_s12 = int_to_ptr.vmem [resolvable:$true] %s1163_s12 }
 0x36e   : > { %s1632_s15 = scalar_lea.vmem %s2033_s12, 1024  ;;  %s1636_s24 = sshll.u32 %s1704_s21, 4  ;;  %s1637_s24 = int_to_ptr.vmem [resolvable:$false] %s1636_s24 }
 0x36f   : > { %p1633_p1 = scmp.ne.s32.totalorder %s2033_s12, %s1632_s15  ;;  %s1638_s16 = scalar_lea.vmem %s1637_s24, 2048 }
 0x370   : > { %p1639_p4 = scmp.lt.s32.totalorder %s2033_s12, %s1637_s24  ;;  %p1640_p7 = scmp.lt.s32.totalorder %s1638_s16, %s1632_s15 }
 0x371   : > { %p1634_p2 = pnand %p1633_p1, %p1803_p5 }
 0x372   : > { %p1641_p8 = por %p1640_p7, %p1639_p4 }
 0x373   : > { %p1635_p3 = pneg %p1634_p2 }
 0x375   : > { %p1642_p9 = pnand %p1641_p8, %p1635_p3 }
 0x426   : > { %v1471_v40 = vpop.f32.mrb[8].mxu1 }
 0x427   : > { %v1074_v41 = vadd.f32 %v1471_v40, %v1326_v39  ;;  %v1065_v42 = vpop.f32.mrb[9].mxu1 }
 0x428   : > { %v1066_v43 = vadd.f32 %v1326_v39, %v1065_v42  ;;  %v1472_v44 = vpop.f32.mrb[10].mxu1 }
 0x429   : > { %v1098_v45 = vsub.f32 0.0, %v1074_v41  ;;  %v1077_v46 = vadd.f32 %v1472_v44, %v1326_v39  ;;  %v1068_v47 = vpop.f32.mrb[11].mxu1 }
 0x42a   : > { %v1096_v48 = vsub.f32 0.0, %v1066_v43  ;;  %v1069_v49 = vadd.f32 %v1326_v39, %v1068_v47 }
 0x42b   : > { %v1108_v50 = vmul.f32 1.442695, %v1098_v45  ;;  %v1099_v51 = vsub.f32 0.0, %v1077_v46 }
 0x42c   : > { %v1104_v53 = vmul.f32 1.442695, %v1096_v48  ;;  %v1097_v55 = vsub.f32 0.0, %v1069_v49 }
 0x42d   : > { %1572 = vpow2.f32 %v1108_v50  ;;  %v1110_v56 = vmul.f32 1.442695, %v1099_v51 }
 0x42e   : > { %1574 = vpow2.f32 %v1104_v53  ;;  %v1106_v58 = vmul.f32 1.442695, %v1097_v55 }
 0x42f   : > { %1576 = vpow2.f32 %v1110_v56  ;;  %v1475_v59 = vpop.f32.mrb[12].mxu1 }
 0x430   : > { %1578 = vpow2.f32 %v1106_v58  ;;  %v1090_v60 = vadd.f32 %v1475_v59, %v1326_v39  ;;  %v1081_v62 = vpop.f32.mrb[13].mxu1 }
 0x431   : > { %v1082_v63 = vadd.f32 %v1326_v39, %v1081_v62  ;;  %v1476_v0 = vpop.f32.mrb[14].mxu1 }
 0x432   : > { %v1102_v57 = vsub.f32 0.0, %v1090_v60  ;;  %v1093_v1 = vadd.f32 %v1476_v0, %v1326_v39  ;;  %v1084_v54 = vpop.f32.mrb[15].mxu1 }
 0x433   : > { %v1100_v61 = vsub.f32 0.0, %v1082_v63  ;;  %v1085_v52 = vadd.f32 %v1326_v39, %v1084_v54 }
 0x434   : > { %v1116_v2 = vmul.f32 1.442695, %v1102_v57  ;;  %v1103_v3 = vsub.f32 0.0, %v1093_v1 }
 0x435   : > { %v1112_v4 = vmul.f32 1.442695, %v1100_v61  ;;  %v1101_v5 = vsub.f32 0.0, %v1085_v52 }
 0x436   : > { %1580 = vpow2.f32 %v1116_v2  ;;  %v1118_v7 = vmul.f32 1.442695, %v1103_v3 }
 0x437   : > { %v1573_v9 = vpop.eup %1572  ;;  %1582 = vpow2.f32 %v1112_v4  ;;  %v1114_v11 = vmul.f32 1.442695, %v1101_v5 }
 0x438   : > { %v1575_v8 = vpop.eup %1574  ;;  %v1122_v6 = vadd.f32 1.0, %v1573_v9  ;;  %1584 = vpow2.f32 %v1118_v7 }
 0x439   : > { %v1577_v10 = vpop.eup %1576  ;;  %v1120_v12 = vadd.f32 1.0, %v1575_v8  ;;  %1586 = vpow2.f32 %v1114_v11 }
 0x43a   : > { %v1579_v13 = vpop.eup %1578  ;;  %1588 = vrcp.f32 %v1122_v6  ;;  %v1123_v14 = vadd.f32 1.0, %v1577_v10 }
 0x43b   : > { %1590 = vrcp.f32 %v1120_v12  ;;  %v1121_v15 = vadd.f32 1.0, %v1579_v13 }
 0x43c   : > { %1592 = vrcp.f32 %v1123_v14 }
 0x43d   : > { %1594 = vrcp.f32 %v1121_v15 }
 0x440   : > { %v1581_v16 = vpop.eup %1580 }
 0x441   : > { %v1583_v17 = vpop.eup %1582  ;;  %v1126_v18 = vadd.f32 1.0, %v1581_v16 }
 0x442   : > { %v1585_v19 = vpop.eup %1584  ;;  %v1124_v20 = vadd.f32 1.0, %v1583_v17 }
 0x443   : > { %v1587_v21 = vpop.eup %1586  ;;  %1596 = vrcp.f32 %v1126_v18  ;;  %v1127_v22 = vadd.f32 1.0, %v1585_v19 }
 0x444   : > { %v1589_v23 = vpop.eup %1588  ;;  %1598 = vrcp.f32 %v1124_v20  ;;  %v1125_v24 = vadd.f32 1.0, %v1587_v21 }
 0x445   : > { %v1591_v25 = vpop.eup %1590  ;;  %1138 = vst [vmem:[%s400_s0 + $0x10] sm:$0xff] %v1589_v23  ;;  %1600 = vrcp.f32 %v1127_v22 }
 0x446   : > { %v1593_v26 = vpop.eup %1592  ;;  %1136 = vst [vmem:[%s400_s0] sm:$0xff] %v1591_v25  ;;  %1602 = vrcp.f32 %v1125_v24 }
 0x447   : > { %v1595_v27 = vpop.eup %1594  ;;  %1139 = vst [vmem:[%s400_s0 + $0x18] sm:$0xff] %v1593_v26 }
 0x448   : > { %1137 = vst [vmem:[%s400_s0 + $0x8] sm:$0xff] %v1595_v27 }
 0x44d   : > { %v1597_v28 = vpop.eup %1596 }
 0x44e   : > { %v1599_v29 = vpop.eup %1598  ;;  %1142 = vst [vmem:[%s400_s0 + $0x30] sm:$0xff] %v1597_v28 }
 0x44f   : > { %v1601_v30 = vpop.eup %1600  ;;  %1140 = vst [vmem:[%s400_s0 + $0x20] sm:$0xff] %v1599_v29 }
 0x450   : > { %v1603_v31 = vpop.eup %1602  ;;  %1143 = vst [vmem:[%s400_s0 + $0x38] sm:$0xff] %v1601_v30 }
 0x451   : > { %1141 = vst [vmem:[%s400_s0 + $0x28] sm:$0xff] %v1603_v31 }
 0x452   : > { %1645 = shalt.err (!%p1642_p9)
}
 0x453   : > { %s1646_s0 = scalar_lea.hbm %s2031_s30, 1024  ;;  %s1650_s21 = scalar_lea.hbm %s2089_s10, 4096 }
 0x454   : > { %p1647_p10 = scmp.ne.s32.totalorder %s2031_s30, %s1646_s0  ;;  %p1651_p13 = scmp.lt.u32.totalorder %s2031_s30, %s2089_s10 }
 0x455   : > { %p1652_p0 = scmp.lt.u32.totalorder %s1650_s21, %s1646_s0  ;;  %p1654_p2 = scmp.lt.u32.totalorder %s1646_s0, %s2031_s30 }
 0x456   : > { %p1648_p11 = pnand %p1647_p10, %p1803_p5 }
 0x457   : > { %p1653_p1 = por %p1652_p0, %p1651_p13 }
 0x458   : > { %p1649_p12 = pneg %p1648_p11 }
 0x459   : > { %p1655_p3 = por %p1654_p2, %p1653_p1 }
 0x45b   : > { %p1656_p4 = pnand %p1655_p3, %p1649_p12 }
 0x45d   : > { %1659 = shalt.err (!%p1656_p4)
}
 0x45e   : > { %s2100_s15 = scalar_lea.sflag [#allocation3], %s1881_s13 }
 0x45f   : > { %1477 = dma.vmem_to_hbm [thread:$0]  (%p1803_p5), %s2033_s12, 1024, %s2031_s30, %s2100_s15, %s1702_s14, %s1702_s14, %s1703_s29  }
 0x460 PF: > { %p1488_p7 = scmp.ge.s32.totalorder %s1698_s20, 2  ;;  %s1194_s26 = sand.u32 1, %s1686_s17  }
 0x461   : > { %s1195_s16 = scalar_lea.sflag [#allocation3], %s1194_s26 }
 0x462   : > { %p1482_p8 = pnand %p1488_p7, %p1807_p6 }
 0x464   : > { %1677 = dma.done.wait (!%p1482_p8), %s1195_s16, 1024  }
 0x465   : > { %1679 = vsyncadd (!%p1482_p8), %s1195_s16, 4294966272  ;;  %s1204_s27 = scalar_lea.sflag [#allocation5], %s1194_s26 }
 0x466   : > { %1681 = dma.done.wait (!%p1482_p8), %s1204_s27, 1024  }
 0x467   : > { %1683 = vsyncadd (!%p1482_p8), %s1204_s27, 4294966272  ;;  %s2101_s13 = sld [smem:[#allocation8_spill]]  ;;  %p25_p5 = scmp.ge.s32.totalorder %s1790_s23, 6  }
 0x468   : > { %s2102_s17 = smov %s1690_s18  ;;  %s2103_s18 = smov %s1694_s19 }
 0x469   : > { %s2105_s20 = smov %s1790_s23  ;;  %27 = sbr.rel (!%p25_p5) target bundleno = 7 (0x7), region = 115 }
 0x46d   : > { %s2104_s19 = smov %s2101_s13 }
 0x470   :  { %1209 = vsyncpa [#allocation3], 1 }
 0x471   :  { %1211 = vsyncpa [#allocation3 + $0x1], 1 }
 0x472   :  { %1212 = vsyncpa [#allocation5], 1 }
 0x473   :  { %1214 = vsyncpa [#allocation5 + $0x1], 1 }

</bundles_post_ra>
